<compile_context>
chip_gen: v7x
topology: tpu7x:2x2x1
jax: 0.10.0
libtpu: 0.0.40
codegen_flags: <defaults>
</compile_context>

<pallas_src>
import functools

import jax
import jax.numpy as jnp
from jax.experimental import pallas as pl
from jax.experimental.pallas import tpu as pltpu

_LANE = 128
_SUBLANE = 8

# Supported torch.nn activation names -> jnp equivalents (applied in-kernel).
_ACTIVATIONS = {
    "ReLU": lambda x: jnp.maximum(x, 0.0),
    "Tanh": jnp.tanh,
    "Sigmoid": jax.nn.sigmoid,
    # torch.nn.GELU default is the exact (erf) form.
    "GELU": lambda x: jax.nn.gelu(x, approximate=False),
    "ELU": jax.nn.elu,
    "LeakyReLU": lambda x: jax.nn.leaky_relu(x, negative_slope=0.01),
    "SiLU": jax.nn.silu,
}


def _round_up(x, m):
    return (x + m - 1) // m * m


def _fused_mlp_kernel(x_ref, w_ref, b_ref, o_ref, h_ref, *, act_fn):
    """Push one (tm, D) activation tile through one layer of the MLP.

    x_ref: (tm, D) f32      w_ref: (1, D, D) bf16   b_ref: (1, 1, D) f32
    o_ref: (tm, D) f32      h_ref: (tm, D) f32 VMEM scratch (layer-resident)
    """
    layer = pl.program_id(1)
    n_layers = pl.num_programs(1)

    @pl.when(layer == 0)
    def _():
        h_ref[...] = x_ref[...]

    # bf16 MXU matmul with f32 accumulation; bias add fused as the epilogue.
    y = jnp.dot(
        h_ref[...].astype(jnp.bfloat16),
        w_ref[0],
        preferred_element_type=jnp.float32,
    )
    y = y + b_ref[0]

    @pl.when(layer < n_layers - 1)
    def _():
        h_ref[...] = act_fn(y)

    @pl.when(layer == n_layers - 1)
    def _():
        o_ref[...] = y.astype(o_ref.dtype)


def _fused_mlp_call(x_pad, w_stack, b_stack, *, act_name, tm):
    n_layers, D, _ = w_stack.shape
    m_pad = x_pad.shape[0]
    grid = (m_pad // tm, n_layers)

    # VMEM budget: double-buffered x / w / b / out blocks + resident scratch.
    vmem_bytes = 2 * (tm * D * 4 + D * D * 2 + D * 4 + tm * D * 4) + tm * D * 4
    compiler_kwargs = dict(dimension_semantics=("parallel", "arbitrary"))
    if vmem_bytes > 24 * 1024 * 1024:
        # Leave headroom but stay under v7x's 64 MiB physical VMEM.
        compiler_kwargs["vmem_limit_bytes"] = min(
            int(vmem_bytes * 3 // 2), 48 * 1024 * 1024
        )

    return pl.pallas_call(
        functools.partial(_fused_mlp_kernel, act_fn=_ACTIVATIONS[act_name]),
        out_shape=jax.ShapeDtypeStruct((m_pad, D), jnp.float32),
        grid_spec=pltpu.PrefetchScalarGridSpec(
            num_scalar_prefetch=0,
            grid=grid,
            in_specs=[
                pl.BlockSpec((tm, D), lambda i, l: (i, 0)),       # activations
                pl.BlockSpec((1, D, D), lambda i, l: (l, 0, 0)),  # layer weight
                pl.BlockSpec((1, 1, D), lambda i, l: (l, 0, 0)),  # layer bias
            ],
            out_specs=pl.BlockSpec((tm, D), lambda i, l: (i, 0)),
            scratch_shapes=[pltpu.VMEM((tm, D), jnp.float32)],
        ),
        compiler_params=pltpu.CompilerParams(**compiler_kwargs),
    )(x_pad, w_stack, b_stack)


@functools.partial(jax.jit, static_argnames=("hidden_activation", "tm_max"))
def mlp_forward(x, params, hidden_activation="ReLU", tm_max=256):
    """Fused MLP forward.

    x: (M, n_features) f32
    params: list of (w_t, b) with w_t already transposed to (in, out), b (out,)
    """
    if hidden_activation not in _ACTIVATIONS:
        raise ValueError(f"unsupported activation: {hidden_activation}")

    n_layers = len(params)
    M, n_features = x.shape
    n_out = params[-1][0].shape[1]

    # Common lane-aligned feature width so all layer weights stack to (L, D, D).
    dims = [n_features] + [w.shape[1] for w, _ in params]
    D = max(_round_up(d, _LANE) for d in dims)

    # Batch tile: sublane-aligned, capped so the tile set stays small in VMEM.
    m_pad = _round_up(M, _SUBLANE)
    tm = min(m_pad, tm_max)
    m_pad = _round_up(m_pad, tm)

    # Zero-pad and stack parameters; weights in bf16, biases in f32.
    w_stack = jnp.zeros((n_layers, D, D), jnp.bfloat16)
    b_stack = jnp.zeros((n_layers, 1, D), jnp.float32)
    for i, (w, b) in enumerate(params):
        k, n = w.shape
        w_stack = w_stack.at[i, :k, :n].set(w.astype(jnp.bfloat16))
        b_stack = b_stack.at[i, 0, :n].set(b.astype(jnp.float32))

    x_pad = (
        jnp.zeros((m_pad, D), jnp.float32)
        .at[:M, :n_features]
        .set(x.astype(jnp.float32))
    )

    out = _fused_mlp_call(
        x_pad, w_stack, b_stack, act_name=hidden_activation, tm=tm
    )
    return out[:M, :n_out]


def init_mlp_params(key, n_features, n_hidden, hidden_size, n_classes):
    """Deterministic parameter init mimicking nn.Linear default (uniform)."""
    dims = [n_features] + [hidden_size] * (n_hidden + 1) + [n_classes]
    params = []
    for i in range(len(dims) - 1):
        fan_in, fan_out = dims[i], dims[i + 1]
        key, kw, kb = jax.random.split(key, 3)
        bound = 1.0 / jnp.sqrt(fan_in)
        # Stored pre-transposed: (in, out), so the kernel does plain x @ W.
        w_t = jax.random.uniform(
            kw, (fan_in, fan_out), jnp.float32, minval=-bound, maxval=bound
        )
        b = jax.random.uniform(
            kb, (fan_out,), jnp.float32, minval=-bound, maxval=bound
        )
        params.append((w_t, b))
    return params


def mlp_reference_f32(x, params, hidden_activation="ReLU"):
    """Pure-JAX f32 reference (matches the PyTorch module's math)."""
    act = _ACTIVATIONS[hidden_activation]
    h = x.astype(jnp.float32)
    for i, (w, b) in enumerate(params):
        h = h @ w + b
        if i != len(params) - 1:
            h = act(h)
    return h


def mlp_reference_bf16(x, params, hidden_activation="ReLU"):
    """Reference with the same bf16-input / f32-accumulate matmuls as the kernel."""
    act = _ACTIVATIONS[hidden_activation]
    h = x.astype(jnp.float32)
    for i, (w, b) in enumerate(params):
        h = (
            jnp.dot(
                h.astype(jnp.bfloat16),
                w.astype(jnp.bfloat16),
                preferred_element_type=jnp.float32,
            )
            + b
        )
        if i != len(params) - 1:
            h = act(h)
    return h


if __name__ == "__main__":
    # Small shapes consistent with the module:
    # batch=8, n_features=32, n_hidden=2, hidden_size=32, n_classes=8, ReLU.
    batch = 8
    n_features = 32
    n_hidden = 2
    hidden_size = 32
    n_classes = 8
    hidden_activation = "ReLU"

    key = jax.random.PRNGKey(0)
    key, kx = jax.random.split(key)
    x = jax.random.normal(kx, (batch, n_features), jnp.float32)
    params = init_mlp_params(key, n_features, n_hidden, hidden_size, n_classes)

    out = mlp_forward(x, params, hidden_activation)
    out = jax.block_until_ready(out)
    assert out.shape == (batch, n_classes), out.shape

    ref_bf16 = mlp_reference_bf16(x, params, hidden_activation)
    ref_f32 = mlp_reference_f32(x, params, hidden_activation)
    assert jnp.allclose(out, ref_bf16, atol=2e-3, rtol=2e-3), \
        "mismatch vs bf16-matmul reference"
    assert jnp.allclose(out, ref_f32, atol=5e-2, rtol=5e-2), \
        "mismatch vs f32 reference"

    print("KERNEL_OK")
</pallas_src>

<mosaic_0001>
module attributes {stable_mosaic.version = 11 : i64} {
  func.func @_fused_mlp_kernel(%arg0: i32, %arg1: i32, %arg2: memref<8x128xf32, #tpu.memory_space<vmem>>, %arg3: memref<1x128x128xbf16, #tpu.memory_space<vmem>>, %arg4: memref<1x1x128xf32, #tpu.memory_space<vmem>>, %arg5: memref<8x128xf32, #tpu.memory_space<vmem>>, %arg6: memref<8x128xf32, #tpu.memory_space<vmem>>) attributes {dimension_semantics = [#tpu.dimension_semantics<parallel>, #tpu.dimension_semantics<arbitrary>], iteration_bounds = array<i64: 1, 4>, scalar_prefetch = 0 : i64, scratch_operands = 1 : i64, tpu.core_type = #tpu.core_type<tc>, window_params = [{transform_indices = @transform_0, window_bounds = array<i64: 8, 128>}, {transform_indices = @transform_1, window_bounds = array<i64: 1, 128, 128>}, {transform_indices = @transform_2, window_bounds = array<i64: 1, 1, 128>}, {transform_indices = @transform_3, window_bounds = array<i64: 8, 128>}]} {
    %c0_i32 = arith.constant 0 : i32
    %0 = arith.cmpi eq, %arg1, %c0_i32 : i32
    %1 = arith.extui %0 : i1 to i32
    %c0_i32_0 = arith.constant 0 : i32
    %2 = arith.cmpi ne, %1, %c0_i32_0 : i32
    scf.if %2 {
      %c0_11 = arith.constant 0 : index
      %c0_12 = arith.constant 0 : index
      %18 = vector.load %arg2[%c0_11, %c0_12] : memref<8x128xf32, #tpu.memory_space<vmem>>, vector<8x128xf32>
      %c0_13 = arith.constant 0 : index
      %c0_14 = arith.constant 0 : index
      %19 = vector.load %arg6[%c0_13, %c0_14] : memref<8x128xf32, #tpu.memory_space<vmem>>, vector<8x128xf32>
      tpu.vector_store %arg6[%c0_13, %c0_14], %18 {strides = array<i32>} : memref<8x128xf32, #tpu.memory_space<vmem>>, vector<8x128xf32>,
    } else {
    }
    %c0 = arith.constant 0 : index
    %c0_1 = arith.constant 0 : index
    %3 = vector.load %arg6[%c0, %c0_1] : memref<8x128xf32, #tpu.memory_space<vmem>>, vector<8x128xf32>
    %4 = arith.truncf %3 : vector<8x128xf32> to vector<8x128xbf16>
    %c0_2 = arith.constant 0 : index
    %c0_3 = arith.constant 0 : index
    %c0_4 = arith.constant 0 : index
    %5 = vector.load %arg3[%c0_2, %c0_3, %c0_4] : memref<1x128x128xbf16, #tpu.memory_space<vmem>>, vector<1x128x128xbf16>
    %6 = vector.shape_cast %5 : vector<1x128x128xbf16> to vector<128x128xbf16>
    %cst = arith.constant dense<0.000000e+00> : vector<8x128xf32>
    %7 = tpu.matmul %4, %6, %cst {dimension_numbers = #tpu.dot_dimension_numbers<[1], [0], [0], [1], [0, 0, 1, 1], [], []>} : vector<8x128xbf16>, vector<128x128xbf16>, vector<8x128xf32> -> vector<8x128xf32>
    %c0_5 = arith.constant 0 : index
    %c0_6 = arith.constant 0 : index
    %c0_7 = arith.constant 0 : index
    %8 = vector.load %arg4[%c0_5, %c0_6, %c0_7] : memref<1x1x128xf32, #tpu.memory_space<vmem>>, vector<1x1x128xf32>
    %9 = vector.shape_cast %8 : vector<1x1x128xf32> to vector<1x128xf32>
    %10 = vector.broadcast %9 : vector<1x128xf32> to vector<8x128xf32>
    %11 = arith.addf %7, %10 : vector<8x128xf32>
    %c3_i32 = arith.constant 3 : i32
    %12 = arith.cmpi slt, %arg1, %c3_i32 : i32
    %13 = arith.extui %12 : i1 to i32
    %c0_i32_8 = arith.constant 0 : i32
    %14 = arith.cmpi ne, %13, %c0_i32_8 : i32
    scf.if %14 {
      %cst_11 = arith.constant 0.000000e+00 : f32
      %18 = vector.broadcast %cst_11 : f32 to vector<8x128xf32>
      %19 = arith.maximumf %11, %18 : vector<8x128xf32>
      %c0_12 = arith.constant 0 : index
      %c0_13 = arith.constant 0 : index
      %20 = vector.load %arg6[%c0_12, %c0_13] : memref<8x128xf32, #tpu.memory_space<vmem>>, vector<8x128xf32>
      tpu.vector_store %arg6[%c0_12, %c0_13], %19 {strides = array<i32>} : memref<8x128xf32, #tpu.memory_space<vmem>>, vector<8x128xf32>,
    } else {
    }
    %c3_i32_9 = arith.constant 3 : i32
    %15 = arith.cmpi eq, %arg1, %c3_i32_9 : i32
    %16 = arith.extui %15 : i1 to i32
    %c0_i32_10 = arith.constant 0 : i32
    %17 = arith.cmpi ne, %16, %c0_i32_10 : i32
    scf.if %17 {
      %c0_11 = arith.constant 0 : index
      %c0_12 = arith.constant 0 : index
      %18 = vector.load %arg5[%c0_11, %c0_12] : memref<8x128xf32, #tpu.memory_space<vmem>>, vector<8x128xf32>
      tpu.vector_store %arg5[%c0_11, %c0_12], %11 {strides = array<i32>} : memref<8x128xf32, #tpu.memory_space<vmem>>, vector<8x128xf32>,
    } else {
    }
    return
  }
  func.func @transform_0(%arg0: i32, %arg1: i32) -> (i32, i32) {
    %c0_i32 = arith.constant 0 : i32
    %c0_i32_0 = arith.constant 0 : i32
    return %arg0, %c0_i32 : i32, i32
  }
  func.func @transform_1(%arg0: i32, %arg1: i32) -> (i32, i32, i32) {
    %c0_i32 = arith.constant 0 : i32
    %c0_i32_0 = arith.constant 0 : i32
    %c0_i32_1 = arith.constant 0 : i32
    return %arg1, %c0_i32, %c0_i32_0 : i32, i32, i32
  }
  func.func @transform_2(%arg0: i32, %arg1: i32) -> (i32, i32, i32) {
    %c0_i32 = arith.constant 0 : i32
    %c0_i32_0 = arith.constant 0 : i32
    %c0_i32_1 = arith.constant 0 : i32
    return %arg1, %c0_i32, %c0_i32_0 : i32, i32, i32
  }
  func.func @transform_3(%arg0: i32, %arg1: i32) -> (i32, i32) {
    %c0_i32 = arith.constant 0 : i32
    %c0_i32_0 = arith.constant 0 : i32
    return %arg0, %c0_i32 : i32, i32
  }
}

</mosaic_0001>

<bundles_post_ra>
// kernel: mlp_forward.1
= control target key start
LH: loop header
LB: loop body
LE: loop exit
PB: predicated region body
PF: predicated region fallthrough
CT: control target
= control target key end

     0   :  { %8 = vsyncpa [#allocation4], 0  ;;  %s590_s12 = smov 0   ;;  %s592_s13 = smov 0   ;;  %s671_s0 = inlined_call_operand.vmem [shape: f32[8,128], index: 0, kind: input, shape index: {}]   ;;  %s672_s1 = inlined_call_operand.vmem [shape: bf16[4,128,128], index: 1, kind: input, shape index: {}]   ;;  %s673_s2 = inlined_call_operand.vmem [shape: f32[4,1,128], index: 2, kind: input, shape index: {}]   ;;  %s674_s3 = inlined_call_operand.hbm [shape: f32[8,128], index: 3, kind: output, shape index: {}]  }
   0x1   :  { %s594_s14 = smov 0  }
   0x2 LB: > { %s419_s15 = sadd.s32 4294967295, %s565_s14   ;;  %s23_s16 = sadd.s32 1, %s561_s13  ;;  %s565_s14 = sphi %s594_s14, %s14_s14   ;;  %s561_s13 = sphi %s592_s13, %s677_s13   ;;  %s557_s12 = sphi %s590_s12, %s676_s12  }
   0x3   : > { %p24_p0 = scmp.ge.s32.totalorder %s23_s16, 4  ;;  %p423_p1 = scmp.ge.s32.totalorder %s565_s14, 1 }
   0x4   : > { %p167_p2 = scmp.lt.s32.totalorder %s565_s14, 5 }
   0x5   : > { %s679_s16 = smov (%p24_p0, %s23_s16), 0 }
   0x6   : > { %p168_p3 = pnand %p423_p1, %p167_p2 }
   0x7   : > { %p197_p4 = scmp.lt.s32.totalorder (!%p168_p3), %s557_s12, 3  ;;  %p426_p5 = scmp.ne.s32.totalorder (!%p168_p3), %s557_s12, 0 }
   0x8   : > { %171 = sbr.rel (%p168_p3) target bundleno = 307 (0x133), region = 32 }
   0xf   : > { %s613_s17 = scalar_select %p197_p4, %s557_s12, 3 }
  0x10   : > { %209 = sbr.rel (%p426_p5) target bundleno = 23 (0x17), region = 36  ;;  %v210_v0 = vld [vmem:[%s671_s0] sm:$0xff] (!%p426_p5) }
  0x11   : > { %s442_s18 = sshll.u32 %s613_s17, 6  ;;  %s204_s21 = scalar_lea.vmem %s673_s2, %s613_s17  ;;  %211 = vst [vmem:[#allocation2] sm:$0xff] (!%p426_p5), %v210_v0 }
  0x12   : > { %s201_s24 = scalar_lea.vmem %s672_s1, %s442_s18 }
  0x17 PF: > { %v505_v1 = vld [vmem:[%s201_s24] sm:$0xff]   ;;  %v567_v2 = vmov 0.0   ;;  %v506_v3 = vld [vmem:[%s201_s24 + $0x8] sm:$0xff]   ;;  %vm568_vm0 = vmmov 0   ;;  %v507_v4 = vld [vmem:[%s201_s24 + $0x10] sm:$0xff]   ;;  %p436_p6 = scmp.ge.s32.totalorder %s557_s12, 3 }
  0x18   : > { %452 = vmatprep.subr.bf16.mxu0 %v567_v2  ;;  %468 = vmatprep.mubr.msk.bf16.mxu0 %vm568_vm0, %v567_v2  ;;  %v508_v5 = vld [vmem:[%s201_s24 + $0x18] sm:$0xff]   ;;  %v509_v6 = vld [vmem:[%s201_s24 + $0x20] sm:$0xff]   ;;  %v510_v7 = vld [vmem:[%s201_s24 + $0x28] sm:$0xff]  }
  0x19   : > { %453 = vmatpush3.bf16.msra.mxu0 %v505_v1  ;;  %v511_v8 = vld [vmem:[%s201_s24 + $0x30] sm:$0xff]   ;;  %v512_v9 = vld [vmem:[%s201_s24 + $0x38] sm:$0xff]   ;;  %v212_v10 = vld [vmem:[#allocation2] sm:$0xff] }
  0x1a   : > { %454 = vmatprep.subr.bf16.mxu0 %v567_v2  ;;  %v213_v11 = vpack.c.bf16 %v212_v10, %v212_v10  ;;  %v427_v12 = vld [vmem:[%s204_s21] ss:$0 sm:$0xff] }
  0x1d   : > { %455 = vmatpush3.bf16.msra.mxu0 %v506_v3 }
  0x1e   : > { %456 = vmatprep.subr.bf16.mxu0 %v567_v2 }
  0x21   : > { %457 = vmatpush3.bf16.msra.mxu0 %v507_v4 }
  0x22   : > { %458 = vmatprep.subr.bf16.mxu0 %v567_v2 }
  0x25   : > { %459 = vmatpush3.bf16.msra.mxu0 %v508_v5 }
  0x26   : > { %460 = vmatprep.subr.bf16.mxu0 %v567_v2 }
  0x29   : > { %461 = vmatpush3.bf16.msra.mxu0 %v509_v6 }
  0x2a   : > { %462 = vmatprep.subr.bf16.mxu0 %v567_v2 }
  0x2d   : > { %463 = vmatpush3.bf16.msra.mxu0 %v510_v7 }
  0x2e   : > { %464 = vmatprep.subr.bf16.mxu0 %v567_v2 }
  0x31   : > { %465 = vmatpush3.bf16.msra.mxu0 %v511_v8 }
  0x32   : > { %466 = vmatprep.subr.bf16.mxu0 %v567_v2 }
  0x35   : > { %467 = vmatpush3.bf16.msra.mxu0 %v512_v9 }
  0x38   : > { %469 = vmatmul.mubr.bf16.vlgmr.msra.gmra.mrb[0].mxu0 %v213_v11 }
 0x108   : > { %328 = sbr.rel (%p436_p6) target bundleno = 273 (0x111), region = 40 }
 0x10b   : > { %v319_v13 = vpop.f32.mrb[0].mxu0 }
 0x10c   : > { %v320_v14 = vadd.f32 %v427_v12, %v319_v13  ;;  %v470_v15 = vpop.f32.mrb[1].mxu0 }
 0x10d   : > { %v322_v16 = vpop.f32.mrb[2].mxu0 }
 0x10e   : > { %v471_v17 = vpop.f32.mrb[3].mxu0  ;;  %v329_v18 = vmax.f32 (!%p436_p6), %v320_v14, 0.0 }
 0x110   : > { %330 = vst [vmem:[#allocation2] sm:$0xff] %v329_v18 }
 0x111 PF: > { %p437_p7 = scmp.ne.s32.totalorder %s557_s12, 3 }
 0x112   : > { %335 = vst [vmem:[#allocation3] sm:$0xff] (!%p437_p7), %v320_v14 }
 0x113   : > { %334 = sbr.rel (%p437_p7) target bundleno = 282 (0x11a), region = 44 }
 0x11a PF: > { %p636_p8 = scmp.eq.s32.totalorder %s419_s15, 3  ;;  %s569_s30 = smov [#allocation3]  }
 0x11b   : > { %s345_s4 = sshll.u32 %s569_s30, 4  ;;  %s346_s4 = int_to_ptr.vmem [resolvable:$true] %s345_s4 }
 0x11c   : > { %s513_s5 = scalar_lea.vmem %s346_s4, 128  ;;  %p520_p12 = scmp.lt.s32.totalorder %s346_s4, %s346_s4 }
 0x11d   : > { %p514_p9 = scmp.ne.s32.totalorder %s346_s4, %s513_s5  ;;  %p521_p13 = scmp.lt.s32.totalorder %s513_s5, %s513_s5 }
 0x11f   : > { %p515_p10 = pnand %p514_p9, %p636_p8  ;;  %p522_p0 = por %p521_p13, %p520_p12 }
 0x121   : > { %p516_p11 = pneg %p515_p10 }
 0x123   : > { %p523_p1 = pnand %p522_p0, %p516_p11 }
 0x125   : > { %526 = shalt.err (!%p523_p1)
}
 0x126   : > { %s527_s8 = scalar_lea.hbm %s674_s3, 128 }
 0x127   : > { %p528_p2 = scmp.ne.s32.totalorder %s674_s3, %s527_s8  ;;  %p533_p5 = scmp.lt.u32.totalorder %s527_s8, %s674_s3 }
 0x129   : > { %p529_p3 = pnand %p528_p2, %p636_p8 }
 0x12b   : > { %p530_p4 = pneg %p529_p3 }
 0x12d   : > { %p535_p6 = pnand %p533_p5, %p530_p4 }
 0x12f   : > { %538 = shalt.err (!%p535_p6)
}
 0x130   : > { %473 = dma.vmem_to_hbm [thread:$0]  (%p636_p8), %s346_s4, 128, %s674_s3, [#allocation4]  }
 0x131   : > { %552 = dma.done.wait (%p636_p8), [#allocation4], 128  }
 0x132   : > { %554 = vsyncadd (%p636_p8), [#allocation4], 4294967168 }
 0x133 PF: > { %s14_s14 = sadd.s32 1, %s565_s14   ;;  %s676_s12 = smov %s561_s13 }
 0x134   : > { %p11_p7 = scmp.ge.s32.totalorder %s14_s14, 6   ;;  %s677_s13 = smov %s679_s16 }
 0x136   :  { %13 = sbr.rel (!%p11_p7) target bundleno = 2 (0x2), region = 78 }
 0x13d   :  { %358 = vsyncpa [#allocation4], 1 }
 0x13e   :  { %360 = vsyncpa [#allocation4 + $0x1], 1 }

</bundles_post_ra>
